<compile_context>
chip_gen: v7x
topology: tpu7x:2x2x1
jax: 0.10.0
libtpu: 0.0.40
codegen_flags: <defaults>
</compile_context>

<pallas_src>
import functools

import jax
import jax.numpy as jnp
import numpy as np
from jax.experimental import pallas as pl
from jax.experimental.pallas import tpu as pltpu


def _round_up(x, m):
    return (x + m - 1) // m * m


def _column_layout(rel_src, num_src_types, seg):
    """Static lane layout: per-SRC-ntype group = [self-loop seg] + [rel segs]."""
    loop_col = [0] * num_src_types
    rel_col = [0] * len(rel_src)
    grp_start = [0] * num_src_types
    grp_width = [0] * num_src_types
    col = 0
    for s in range(num_src_types):
        grp_start[s] = col
        loop_col[s] = col
        col += seg
        for r, src in enumerate(rel_src):
            if src == s:
                rel_col[r] = col
                col += seg
        grp_width[s] = col - grp_start[s]
    return (tuple(loop_col), tuple(rel_col), tuple(grp_start),
            tuple(grp_width)), col


# ----------------------------------------------------------------------------
# Fused two-layer kernel. Single grid step; everything is VMEM-resident.
# Relation structure and lane layout are compile-time-static Python data.
# ----------------------------------------------------------------------------
def _fused_entity_classify_kernel(
        x_ref, a_ref, w1_ref, w2_ref, o_ref, *,
        rel_src, rel_dst, num_nodes, layout1, layout2, seg1, seg2):
    T = len(num_nodes)
    R = len(rel_src)
    n_max = a_ref.shape[1]

    def layer(lhs, w_ref, seg, layout):
        loop_col, rel_col, grp_start, grp_width = layout
        # ONE wide MXU pass per SRC ntype: computes the self-loop term (+bias,
        # folded into the packed weights) and every outgoing-relation message.
        y = [jnp.dot(lhs[s],
                     w_ref[:, grp_start[s]:grp_start[s] + grp_width[s]],
                     preferred_element_type=jnp.float32)
             for s in range(T)]
        outs = []
        for t in range(T):
            lo = loop_col[t] - grp_start[t]
            acc = y[t][:, lo:lo + seg]                  # self-loop + bias (f32)
            for r in range(R):                          # static per-dst rel set
                if rel_dst[r] != t:
                    continue
                s = rel_src[r]
                mo = rel_col[r] - grp_start[s]
                msg = y[s][:, mo:mo + seg].astype(a_ref.dtype)
                acc = acc + jnp.dot(a_ref[r], msg,
                                    preferred_element_type=jnp.float32)
            outs.append(acc)
        return outs

    x = [x_ref[s] for s in range(T)]
    h1 = layer(x, w1_ref, seg1, layout1)
    # ReLU; no pad-row mask here (padded src columns of a_norm are zero, so
    # garbage in padded h1 rows never reaches valid dst rows).
    h1 = [jnp.maximum(h, 0.0).astype(jnp.bfloat16) for h in h1]
    h2 = layer(h1, w2_ref, seg2, layout2)

    rows = jax.lax.broadcasted_iota(jnp.int32, (n_max, seg2), 0)  # hoisted once
    for t in range(T):
        o_ref[t] = jnp.where(rows < num_nodes[t], h2[t], 0.0).astype(o_ref.dtype)


# ----------------------------------------------------------------------------
# Factory: builds (one-time weight packer, jitted forward) for a static graph.
# ----------------------------------------------------------------------------
def build_entity_classify(rel_src, rel_dst, num_nodes, in_size, hidden,
                          out_size, n_max):
    rel_src = tuple(int(s) for s in rel_src)
    rel_dst = tuple(int(d) for d in rel_dst)
    num_nodes = tuple(int(n) for n in num_nodes)
    T, R = len(num_nodes), len(rel_src)
    h_pad = _round_up(hidden, 128)       # lane-dense intermediate width
    out_pad = _round_up(out_size, 128)   # lane-dense output width
    # Layer-2 bias is folded via a spare h1 lane pinned to 1.0.
    assert hidden < h_pad, "need a spare h1 lane for the layer-2 bias fold"

    layout1, total1 = _column_layout(rel_src, T, h_pad)
    layout2, total2 = _column_layout(rel_src, T, out_pad)

    def pack_weights(params):
        """One-time init: pad, fold biases, cast bf16, pack into 2 HBM slabs."""
        loop1, rel1 = layout1[0], layout1[1]
        loop2, rel2 = layout2[0], layout2[1]
        w1 = jnp.zeros((in_size + 1, total1), jnp.float32)
        w2 = jnp.zeros((h_pad, total2), jnp.float32)
        for t in range(T):
            c = loop1[t]
            w1 = w1.at[:in_size, c:c + hidden].set(params["w_loop1"][t])
            w1 = w1.at[in_size, c:c + hidden].set(params["b_loop1"][t, 0])
            # pin h1[:, hidden] to exactly 1.0 (driven by the appended ones
            # column of x_aug) so the layer-2 bias can live in W2 row `hidden`.
            w1 = w1.at[in_size, c + hidden].set(1.0)
            c = loop2[t]
            w2 = w2.at[:hidden, c:c + out_size].set(params["w_loop2"][t])
            w2 = w2.at[hidden, c:c + out_size].set(params["b_loop2"][t, 0])
        for r in range(R):
            c = rel1[r]
            w1 = w1.at[:in_size, c:c + hidden].set(params["w_rel1"][r])
            c = rel2[r]
            w2 = w2.at[:hidden, c:c + out_size].set(params["w_rel2"][r])
        return w1.astype(jnp.bfloat16), w2.astype(jnp.bfloat16)

    kernel = functools.partial(
        _fused_entity_classify_kernel,
        rel_src=rel_src, rel_dst=rel_dst, num_nodes=num_nodes,
        layout1=layout1, layout2=layout2, seg1=h_pad, seg2=out_pad)

    def full(shape):
        return pl.BlockSpec(shape, lambda i, _n=len(shape): (0,) * _n)

    call = pl.pallas_call(
        kernel,
        out_shape=jax.ShapeDtypeStruct((T, n_max, out_pad), jnp.float32),
        grid=(1,),
        in_specs=[
            full((T, n_max, in_size + 1)),   # features (+ ones column)
            full((R, n_max, n_max)),         # right-normalized adjacency
            full((in_size + 1, total1)),     # packed layer-1 weights (+bias row)
            full((h_pad, total2)),           # packed layer-2 weights (+bias row)
        ],
        out_specs=full((T, n_max, out_pad)),
        compiler_params=pltpu.CompilerParams(
            # TODO(synk): at real sizes add a leading 'parallel' dst-row-tile
            # grid axis so v7x's second TensorCore is used.
            dimension_semantics=("arbitrary",),
        ),
    )

    @jax.jit
    def forward(x_all, a_norm, w1_packed, w2_packed):
        ones = jnp.ones((T, n_max, 1), x_all.dtype)
        x_aug = jnp.concatenate([x_all, ones], axis=-1).astype(jnp.bfloat16)
        out = call(x_aug, a_norm.astype(jnp.bfloat16), w1_packed, w2_packed)
        # TODO(synk): emit bf16 / only out_size lanes at scale to halve writeback.
        return out[:, :, :out_size]

    return pack_weights, forward


# ----------------------------------------------------------------------------
# Pure-JAX reference (per-ntype, unpadded, f32) for correctness checking.
# ----------------------------------------------------------------------------
def ref_layer(x_dict, adj_dict, relations, ntypes, w_rel, w_loop, b_loop, relu):
    out = {}
    for ti, nt in enumerate(ntypes):
        h = x_dict[nt] @ w_loop[ti] + b_loop[ti, 0]
        for ri, (st, _, dt) in enumerate(relations):
            if dt != nt:
                continue
            a = adj_dict[ri]                              # [n_dst, n_src]
            deg = jnp.maximum(a.sum(axis=1, keepdims=True), 1.0)
            msg = x_dict[st] @ w_rel[ri]
            h = h + (a @ msg) / deg
        if relu:
            h = jnp.maximum(h, 0.0)
        out[nt] = h
    return out


if __name__ == "__main__":
    key = jax.random.PRNGKey(0)

    # --- synthetic heterogeneous graph -----------------------------------
    ntypes = ["author", "paper", "topic"]
    num_nodes = {"author": 10, "paper": 12, "topic": 6}
    relations = [  # (src_ntype, etype, dst_ntype), sorted by etype name
        ("paper", "about", "topic"),
        ("topic", "covers", "paper"),
        ("author", "writes", "paper"),
        ("paper", "written_by", "author"),
    ]
    T, R = len(ntypes), len(relations)
    N_MAX = 16
    IN_SIZE, HIDDEN, OUT_SIZE = 16, 64, 8

    nt_idx = {nt: i for i, nt in enumerate(ntypes)}
    rel_src = [nt_idx[s] for s, _, _ in relations]
    rel_dst = [nt_idx[d] for _, _, d in relations]
    n_per_type = [num_nodes[nt] for nt in ntypes]

    # node features per ntype, padded into [T, N_MAX, IN_SIZE]
    keys = jax.random.split(key, 16)
    x_dict = {}
    x_all = jnp.zeros((T, N_MAX, IN_SIZE), jnp.float32)
    for i, nt in enumerate(ntypes):
        n = num_nodes[nt]
        x = jax.random.normal(keys[i], (n, IN_SIZE), jnp.float32)
        x_dict[nt] = x
        x_all = x_all.at[i, :n, :].set(x)

    # adjacency per relation: [dst, src] 0/1, plus padded right-normalized form
    adj_dict = {}
    a_norm = jnp.zeros((R, N_MAX, N_MAX), jnp.float32)
    for ri, (st, _, dt) in enumerate(relations):
        nd, ns = num_nodes[dt], num_nodes[st]
        a = jax.random.bernoulli(keys[4 + ri], 0.3, (nd, ns)).astype(jnp.float32)
        adj_dict[ri] = a
        deg = jnp.maximum(a.sum(axis=1, keepdims=True), 1.0)
        a_norm = a_norm.at[ri, :nd, :ns].set(a / deg)

    # --- deterministic parameters (shapes per module __init__) -----------
    def init_w(k, shape):
        return jax.random.normal(k, shape, jnp.float32) * 0.1

    pkeys = jax.random.split(jax.random.PRNGKey(42), 8)
    params = {
        "w_rel1":  init_w(pkeys[0], (R, IN_SIZE, HIDDEN)),
        "w_loop1": init_w(pkeys[1], (T, IN_SIZE, HIDDEN)),
        "b_loop1": init_w(pkeys[2], (T, 1, HIDDEN)),
        "w_rel2":  init_w(pkeys[3], (R, HIDDEN, OUT_SIZE)),
        "w_loop2": init_w(pkeys[4], (T, HIDDEN, OUT_SIZE)),
        "b_loop2": init_w(pkeys[5], (T, 1, OUT_SIZE)),
    }

    # --- build jitted forward; pack/pad/cast weights ONCE at init ---------
    pack_weights, forward = build_entity_classify(
        rel_src, rel_dst, n_per_type, IN_SIZE, HIDDEN, OUT_SIZE, N_MAX)
    w1_packed, w2_packed = pack_weights(params)

    out = forward(x_all, a_norm, w1_packed, w2_packed)
    out = jax.block_until_ready(out)

    # --- reference check (f32 reference vs bf16-input kernel) --------------
    h_ref = ref_layer(x_dict, adj_dict, relations, ntypes,
                      params["w_rel1"], params["w_loop1"], params["b_loop1"],
                      relu=True)
    h_ref = ref_layer(h_ref, adj_dict, relations, ntypes,
                      params["w_rel2"], params["w_loop2"], params["b_loop2"],
                      relu=False)
    for i, nt in enumerate(ntypes):
        n = num_nodes[nt]
        np.testing.assert_allclose(np.asarray(out[i, :n]),
                                   np.asarray(h_ref[nt]),
                                   rtol=3e-2, atol=3e-2)
        # padded rows must be exactly zero (masked in-kernel)
        np.testing.assert_array_equal(np.asarray(out[i, n:]), 0.0)

    print("KERNEL_OK")
</pallas_src>

<mosaic_0001>
module attributes {stable_mosaic.version = 11 : i64} {
  func.func @_fused_entity_classify_kernel(%arg0: i32, %arg1: memref<3x16x17xbf16, #tpu.memory_space<vmem>>, %arg2: memref<4x16x16xbf16, #tpu.memory_space<vmem>>, %arg3: memref<17x896xbf16, #tpu.memory_space<vmem>>, %arg4: memref<128x896xbf16, #tpu.memory_space<vmem>>, %arg5: memref<3x16x128xf32, #tpu.memory_space<vmem>>) attributes {dimension_semantics = [#tpu.dimension_semantics<arbitrary>], iteration_bounds = array<i64: 1>, scalar_prefetch = 0 : i64, scratch_operands = 0 : i64, tpu.core_type = #tpu.core_type<tc>, window_params = [{pipeline_mode = #tpu.pipeline_mode<synchronous>, transform_indices = @transform_0, window_bounds = array<i64: 3, 16, 17>}, {pipeline_mode = #tpu.pipeline_mode<synchronous>, transform_indices = @transform_1, window_bounds = array<i64: 4, 16, 16>}, {pipeline_mode = #tpu.pipeline_mode<synchronous>, transform_indices = @transform_2, window_bounds = array<i64: 17, 896>}, {pipeline_mode = #tpu.pipeline_mode<synchronous>, transform_indices = @transform_3, window_bounds = array<i64: 128, 896>}, {pipeline_mode = #tpu.pipeline_mode<synchronous>, transform_indices = @transform_4, window_bounds = array<i64: 3, 16, 128>}]} {
    %c0 = arith.constant 0 : index
    %c0_0 = arith.constant 0 : index
    %c0_1 = arith.constant 0 : index
    %0 = vector.load %arg1[%c0, %c0_0, %c0_1] : memref<3x16x17xbf16, #tpu.memory_space<vmem>>, vector<1x16x17xbf16>
    %1 = vector.shape_cast %0 : vector<1x16x17xbf16> to vector<16x17xbf16>
    %c1 = arith.constant 1 : index
    %c0_2 = arith.constant 0 : index
    %c0_3 = arith.constant 0 : index
    %2 = vector.load %arg1[%c1, %c0_2, %c0_3] : memref<3x16x17xbf16, #tpu.memory_space<vmem>>, vector<1x16x17xbf16>
    %3 = vector.shape_cast %2 : vector<1x16x17xbf16> to vector<16x17xbf16>
    %c2 = arith.constant 2 : index
    %c0_4 = arith.constant 0 : index
    %c0_5 = arith.constant 0 : index
    %4 = vector.load %arg1[%c2, %c0_4, %c0_5] : memref<3x16x17xbf16, #tpu.memory_space<vmem>>, vector<1x16x17xbf16>
    %5 = vector.shape_cast %4 : vector<1x16x17xbf16> to vector<16x17xbf16>
    %c0_6 = arith.constant 0 : index
    %c0_7 = arith.constant 0 : index
    %6 = vector.load %arg3[%c0_6, %c0_7] : memref<17x896xbf16, #tpu.memory_space<vmem>>, vector<17x256xbf16>
    %cst = arith.constant dense<0.000000e+00> : vector<16x256xf32>
    %7 = tpu.matmul %1, %6, %cst {dimension_numbers = #tpu.dot_dimension_numbers<[1], [0], [0], [1], [0, 0, 1, 1], [], []>} : vector<16x17xbf16>, vector<17x256xbf16>, vector<16x256xf32> -> vector<16x256xf32>
    %c0_8 = arith.constant 0 : index
    %c256 = arith.constant 256 : index
    %8 = vector.load %arg3[%c0_8, %c256] : memref<17x896xbf16, #tpu.memory_space<vmem>>, vector<17x384xbf16>
    %cst_9 = arith.constant dense<0.000000e+00> : vector<16x384xf32>
    %9 = tpu.matmul %3, %8, %cst_9 {dimension_numbers = #tpu.dot_dimension_numbers<[1], [0], [0], [1], [0, 0, 1, 1], [], []>} : vector<16x17xbf16>, vector<17x384xbf16>, vector<16x384xf32> -> vector<16x384xf32>
    %c0_10 = arith.constant 0 : index
    %c640 = arith.constant 640 : index
    %10 = vector.load %arg3[%c0_10, %c640] : memref<17x896xbf16, #tpu.memory_space<vmem>>, vector<17x256xbf16>
    %cst_11 = arith.constant dense<0.000000e+00> : vector<16x256xf32>
    %11 = tpu.matmul %5, %10, %cst_11 {dimension_numbers = #tpu.dot_dimension_numbers<[1], [0], [0], [1], [0, 0, 1, 1], [], []>} : vector<16x17xbf16>, vector<17x256xbf16>, vector<16x256xf32> -> vector<16x256xf32>
    %12 = vector.extract_strided_slice %7 {offsets = [0, 0], sizes = [16, 128], strides = [1, 1]} : vector<16x256xf32> to vector<16x128xf32>
    %13 = vector.extract_strided_slice %9 {offsets = [0, 256], sizes = [16, 128], strides = [1, 1]} : vector<16x384xf32> to vector<16x128xf32>
    %14 = arith.truncf %13 : vector<16x128xf32> to vector<16x128xbf16>
    %c3 = arith.constant 3 : index
    %c0_12 = arith.constant 0 : index
    %c0_13 = arith.constant 0 : index
    %15 = vector.load %arg2[%c3, %c0_12, %c0_13] : memref<4x16x16xbf16, #tpu.memory_space<vmem>>, vector<1x16x16xbf16>
    %16 = vector.shape_cast %15 : vector<1x16x16xbf16> to vector<16x16xbf16>
    %cst_14 = arith.constant dense<0.000000e+00> : vector<16x128xf32>
    %17 = tpu.matmul %16, %14, %cst_14 {dimension_numbers = #tpu.dot_dimension_numbers<[1], [0], [0], [1], [0, 0, 1, 1], [], []>} : vector<16x16xbf16>, vector<16x128xbf16>, vector<16x128xf32> -> vector<16x128xf32>
    %18 = arith.addf %12, %17 : vector<16x128xf32>
    %19 = vector.extract_strided_slice %9 {offsets = [0, 0], sizes = [16, 128], strides = [1, 1]} : vector<16x384xf32> to vector<16x128xf32>
    %20 = vector.extract_strided_slice %11 {offsets = [0, 128], sizes = [16, 128], strides = [1, 1]} : vector<16x256xf32> to vector<16x128xf32>
    %21 = arith.truncf %20 : vector<16x128xf32> to vector<16x128xbf16>
    %c1_15 = arith.constant 1 : index
    %c0_16 = arith.constant 0 : index
    %c0_17 = arith.constant 0 : index
    %22 = vector.load %arg2[%c1_15, %c0_16, %c0_17] : memref<4x16x16xbf16, #tpu.memory_space<vmem>>, vector<1x16x16xbf16>
    %23 = vector.shape_cast %22 : vector<1x16x16xbf16> to vector<16x16xbf16>
    %cst_18 = arith.constant dense<0.000000e+00> : vector<16x128xf32>
    %24 = tpu.matmul %23, %21, %cst_18 {dimension_numbers = #tpu.dot_dimension_numbers<[1], [0], [0], [1], [0, 0, 1, 1], [], []>} : vector<16x16xbf16>, vector<16x128xbf16>, vector<16x128xf32> -> vector<16x128xf32>
    %25 = arith.addf %19, %24 : vector<16x128xf32>
    %26 = vector.extract_strided_slice %7 {offsets = [0, 128], sizes = [16, 128], strides = [1, 1]} : vector<16x256xf32> to vector<16x128xf32>
    %27 = arith.truncf %26 : vector<16x128xf32> to vector<16x128xbf16>
    %c2_19 = arith.constant 2 : index
    %c0_20 = arith.constant 0 : index
    %c0_21 = arith.constant 0 : index
    %28 = vector.load %arg2[%c2_19, %c0_20, %c0_21] : memref<4x16x16xbf16, #tpu.memory_space<vmem>>, vector<1x16x16xbf16>
    %29 = vector.shape_cast %28 : vector<1x16x16xbf16> to vector<16x16xbf16>
    %cst_22 = arith.constant dense<0.000000e+00> : vector<16x128xf32>
    %30 = tpu.matmul %29, %27, %cst_22 {dimension_numbers = #tpu.dot_dimension_numbers<[1], [0], [0], [1], [0, 0, 1, 1], [], []>} : vector<16x16xbf16>, vector<16x128xbf16>, vector<16x128xf32> -> vector<16x128xf32>
    %31 = arith.addf %25, %30 : vector<16x128xf32>
    %32 = vector.extract_strided_slice %11 {offsets = [0, 0], sizes = [16, 128], strides = [1, 1]} : vector<16x256xf32> to vector<16x128xf32>
    %33 = vector.extract_strided_slice %9 {offsets = [0, 128], sizes = [16, 128], strides = [1, 1]} : vector<16x384xf32> to vector<16x128xf32>
    %34 = arith.truncf %33 : vector<16x128xf32> to vector<16x128xbf16>
    %c0_23 = arith.constant 0 : index
    %c0_24 = arith.constant 0 : index
    %c0_25 = arith.constant 0 : index
    %35 = vector.load %arg2[%c0_23, %c0_24, %c0_25] : memref<4x16x16xbf16, #tpu.memory_space<vmem>>, vector<1x16x16xbf16>
    %36 = vector.shape_cast %35 : vector<1x16x16xbf16> to vector<16x16xbf16>
    %cst_26 = arith.constant dense<0.000000e+00> : vector<16x128xf32>
    %37 = tpu.matmul %36, %34, %cst_26 {dimension_numbers = #tpu.dot_dimension_numbers<[1], [0], [0], [1], [0, 0, 1, 1], [], []>} : vector<16x16xbf16>, vector<16x128xbf16>, vector<16x128xf32> -> vector<16x128xf32>
    %38 = arith.addf %32, %37 : vector<16x128xf32>
    %cst_27 = arith.constant 0.000000e+00 : f32
    %39 = vector.broadcast %cst_27 : f32 to vector<16x128xf32>
    %40 = arith.maximumf %18, %39 : vector<16x128xf32>
    %41 = arith.truncf %40 : vector<16x128xf32> to vector<16x128xbf16>
    %cst_28 = arith.constant 0.000000e+00 : f32
    %42 = vector.broadcast %cst_28 : f32 to vector<16x128xf32>
    %43 = arith.maximumf %31, %42 : vector<16x128xf32>
    %44 = arith.truncf %43 : vector<16x128xf32> to vector<16x128xbf16>
    %cst_29 = arith.constant 0.000000e+00 : f32
    %45 = vector.broadcast %cst_29 : f32 to vector<16x128xf32>
    %46 = arith.maximumf %38, %45 : vector<16x128xf32>
    %47 = arith.truncf %46 : vector<16x128xf32> to vector<16x128xbf16>
    %c0_30 = arith.constant 0 : index
    %c0_31 = arith.constant 0 : index
    %48 = vector.load %arg4[%c0_30, %c0_31] : memref<128x896xbf16, #tpu.memory_space<vmem>>, vector<128x256xbf16>
    %cst_32 = arith.constant dense<0.000000e+00> : vector<16x256xf32>
    %49 = tpu.matmul %41, %48, %cst_32 {dimension_numbers = #tpu.dot_dimension_numbers<[1], [0], [0], [1], [0, 0, 1, 1], [], []>} : vector<16x128xbf16>, vector<128x256xbf16>, vector<16x256xf32> -> vector<16x256xf32>
    %c0_33 = arith.constant 0 : index
    %c256_34 = arith.constant 256 : index
    %50 = vector.load %arg4[%c0_33, %c256_34] : memref<128x896xbf16, #tpu.memory_space<vmem>>, vector<128x384xbf16>
    %cst_35 = arith.constant dense<0.000000e+00> : vector<16x384xf32>
    %51 = tpu.matmul %44, %50, %cst_35 {dimension_numbers = #tpu.dot_dimension_numbers<[1], [0], [0], [1], [0, 0, 1, 1], [], []>} : vector<16x128xbf16>, vector<128x384xbf16>, vector<16x384xf32> -> vector<16x384xf32>
    %c0_36 = arith.constant 0 : index
    %c640_37 = arith.constant 640 : index
    %52 = vector.load %arg4[%c0_36, %c640_37] : memref<128x896xbf16, #tpu.memory_space<vmem>>, vector<128x256xbf16>
    %cst_38 = arith.constant dense<0.000000e+00> : vector<16x256xf32>
    %53 = tpu.matmul %47, %52, %cst_38 {dimension_numbers = #tpu.dot_dimension_numbers<[1], [0], [0], [1], [0, 0, 1, 1], [], []>} : vector<16x128xbf16>, vector<128x256xbf16>, vector<16x256xf32> -> vector<16x256xf32>
    %54 = vector.extract_strided_slice %49 {offsets = [0, 0], sizes = [16, 128], strides = [1, 1]} : vector<16x256xf32> to vector<16x128xf32>
    %55 = vector.extract_strided_slice %51 {offsets = [0, 256], sizes = [16, 128], strides = [1, 1]} : vector<16x384xf32> to vector<16x128xf32>
    %56 = arith.truncf %55 : vector<16x128xf32> to vector<16x128xbf16>
    %c3_39 = arith.constant 3 : index
    %c0_40 = arith.constant 0 : index
    %c0_41 = arith.constant 0 : index
    %57 = vector.load %arg2[%c3_39, %c0_40, %c0_41] : memref<4x16x16xbf16, #tpu.memory_space<vmem>>, vector<1x16x16xbf16>
    %58 = vector.shape_cast %57 : vector<1x16x16xbf16> to vector<16x16xbf16>
    %cst_42 = arith.constant dense<0.000000e+00> : vector<16x128xf32>
    %59 = tpu.matmul %58, %56, %cst_42 {dimension_numbers = #tpu.dot_dimension_numbers<[1], [0], [0], [1], [0, 0, 1, 1], [], []>} : vector<16x16xbf16>, vector<16x128xbf16>, vector<16x128xf32> -> vector<16x128xf32>
    %60 = arith.addf %54, %59 : vector<16x128xf32>
    %61 = vector.extract_strided_slice %51 {offsets = [0, 0], sizes = [16, 128], strides = [1, 1]} : vector<16x384xf32> to vector<16x128xf32>
    %62 = vector.extract_strided_slice %53 {offsets = [0, 128], sizes = [16, 128], strides = [1, 1]} : vector<16x256xf32> to vector<16x128xf32>
    %63 = arith.truncf %62 : vector<16x128xf32> to vector<16x128xbf16>
    %c1_43 = arith.constant 1 : index
    %c0_44 = arith.constant 0 : index
    %c0_45 = arith.constant 0 : index
    %64 = vector.load %arg2[%c1_43, %c0_44, %c0_45] : memref<4x16x16xbf16, #tpu.memory_space<vmem>>, vector<1x16x16xbf16>
    %65 = vector.shape_cast %64 : vector<1x16x16xbf16> to vector<16x16xbf16>
    %cst_46 = arith.constant dense<0.000000e+00> : vector<16x128xf32>
    %66 = tpu.matmul %65, %63, %cst_46 {dimension_numbers = #tpu.dot_dimension_numbers<[1], [0], [0], [1], [0, 0, 1, 1], [], []>} : vector<16x16xbf16>, vector<16x128xbf16>, vector<16x128xf32> -> vector<16x128xf32>
    %67 = arith.addf %61, %66 : vector<16x128xf32>
    %68 = vector.extract_strided_slice %49 {offsets = [0, 128], sizes = [16, 128], strides = [1, 1]} : vector<16x256xf32> to vector<16x128xf32>
    %69 = arith.truncf %68 : vector<16x128xf32> to vector<16x128xbf16>
    %c2_47 = arith.constant 2 : index
    %c0_48 = arith.constant 0 : index
    %c0_49 = arith.constant 0 : index
    %70 = vector.load %arg2[%c2_47, %c0_48, %c0_49] : memref<4x16x16xbf16, #tpu.memory_space<vmem>>, vector<1x16x16xbf16>
    %71 = vector.shape_cast %70 : vector<1x16x16xbf16> to vector<16x16xbf16>
    %cst_50 = arith.constant dense<0.000000e+00> : vector<16x128xf32>
    %72 = tpu.matmul %71, %69, %cst_50 {dimension_numbers = #tpu.dot_dimension_numbers<[1], [0], [0], [1], [0, 0, 1, 1], [], []>} : vector<16x16xbf16>, vector<16x128xbf16>, vector<16x128xf32> -> vector<16x128xf32>
    %73 = arith.addf %67, %72 : vector<16x128xf32>
    %74 = vector.extract_strided_slice %53 {offsets = [0, 0], sizes = [16, 128], strides = [1, 1]} : vector<16x256xf32> to vector<16x128xf32>
    %75 = vector.extract_strided_slice %51 {offsets = [0, 128], sizes = [16, 128], strides = [1, 1]} : vector<16x384xf32> to vector<16x128xf32>
    %76 = arith.truncf %75 : vector<16x128xf32> to vector<16x128xbf16>
    %c0_51 = arith.constant 0 : index
    %c0_52 = arith.constant 0 : index
    %c0_53 = arith.constant 0 : index
    %77 = vector.load %arg2[%c0_51, %c0_52, %c0_53] : memref<4x16x16xbf16, #tpu.memory_space<vmem>>, vector<1x16x16xbf16>
    %78 = vector.shape_cast %77 : vector<1x16x16xbf16> to vector<16x16xbf16>
    %cst_54 = arith.constant dense<0.000000e+00> : vector<16x128xf32>
    %79 = tpu.matmul %78, %76, %cst_54 {dimension_numbers = #tpu.dot_dimension_numbers<[1], [0], [0], [1], [0, 0, 1, 1], [], []>} : vector<16x16xbf16>, vector<16x128xbf16>, vector<16x128xf32> -> vector<16x128xf32>
    %80 = arith.addf %74, %79 : vector<16x128xf32>
    %81 = tpu.iota {dimensions = array<i32: 0>} : vector<16x128xi32>
    %c10_i32 = arith.constant 10 : i32
    %82 = vector.broadcast %c10_i32 : i32 to vector<16x128xi32>
    %83 = arith.cmpi slt, %81, %82 : vector<16x128xi32>
    %cst_55 = arith.constant 0.000000e+00 : f32
    %84 = vector.broadcast %cst_55 : f32 to vector<16x128xf32>
    %85 = arith.select %83, %60, %84 : vector<16x128xi1>, vector<16x128xf32>
    %c0_56 = arith.constant 0 : index
    %c0_57 = arith.constant 0 : index
    %c0_58 = arith.constant 0 : index
    %86 = vector.load %arg5[%c0_56, %c0_57, %c0_58] : memref<3x16x128xf32, #tpu.memory_space<vmem>>, vector<1x16x128xf32>
    %87 = vector.shape_cast %86 : vector<1x16x128xf32> to vector<16x128xf32>
    %88 = vector.shape_cast %85 : vector<16x128xf32> to vector<1x16x128xf32>
    tpu.vector_store %arg5[%c0_56, %c0_57, %c0_58], %88 {strides = array<i32>} : memref<3x16x128xf32, #tpu.memory_space<vmem>>, vector<1x16x128xf32>,
    %c12_i32 = arith.constant 12 : i32
    %89 = vector.broadcast %c12_i32 : i32 to vector<16x128xi32>
    %90 = arith.cmpi slt, %81, %89 : vector<16x128xi32>
    %cst_59 = arith.constant 0.000000e+00 : f32
    %91 = vector.broadcast %cst_59 : f32 to vector<16x128xf32>
    %92 = arith.select %90, %73, %91 : vector<16x128xi1>, vector<16x128xf32>
    %c1_60 = arith.constant 1 : index
    %c0_61 = arith.constant 0 : index
    %c0_62 = arith.constant 0 : index
    %93 = vector.load %arg5[%c1_60, %c0_61, %c0_62] : memref<3x16x128xf32, #tpu.memory_space<vmem>>, vector<1x16x128xf32>
    %94 = vector.shape_cast %93 : vector<1x16x128xf32> to vector<16x128xf32>
    %95 = vector.shape_cast %92 : vector<16x128xf32> to vector<1x16x128xf32>
    tpu.vector_store %arg5[%c1_60, %c0_61, %c0_62], %95 {strides = array<i32>} : memref<3x16x128xf32, #tpu.memory_space<vmem>>, vector<1x16x128xf32>,
    %c6_i32 = arith.constant 6 : i32
    %96 = vector.broadcast %c6_i32 : i32 to vector<16x128xi32>
    %97 = arith.cmpi slt, %81, %96 : vector<16x128xi32>
    %cst_63 = arith.constant 0.000000e+00 : f32
    %98 = vector.broadcast %cst_63 : f32 to vector<16x128xf32>
    %99 = arith.select %97, %80, %98 : vector<16x128xi1>, vector<16x128xf32>
    %c2_64 = arith.constant 2 : index
    %c0_65 = arith.constant 0 : index
    %c0_66 = arith.constant 0 : index
    %100 = vector.load %arg5[%c2_64, %c0_65, %c0_66] : memref<3x16x128xf32, #tpu.memory_space<vmem>>, vector<1x16x128xf32>
    %101 = vector.shape_cast %100 : vector<1x16x128xf32> to vector<16x128xf32>
    %102 = vector.shape_cast %99 : vector<16x128xf32> to vector<1x16x128xf32>
    tpu.vector_store %arg5[%c2_64, %c0_65, %c0_66], %102 {strides = array<i32>} : memref<3x16x128xf32, #tpu.memory_space<vmem>>, vector<1x16x128xf32>,
    return
  }
  func.func @transform_0(%arg0: i32) -> (i32, i32, i32) {
    %c0_i32 = arith.constant 0 : i32
    %c0_i32_0 = arith.constant 0 : i32
    %c0_i32_1 = arith.constant 0 : i32
    %c0_i32_2 = arith.constant 0 : i32
    return %c0_i32, %c0_i32_0, %c0_i32_1 : i32, i32, i32
  }
  func.func @transform_1(%arg0: i32) -> (i32, i32, i32) {
    %c0_i32 = arith.constant 0 : i32
    %c0_i32_0 = arith.constant 0 : i32
    %c0_i32_1 = arith.constant 0 : i32
    %c0_i32_2 = arith.constant 0 : i32
    return %c0_i32, %c0_i32_0, %c0_i32_1 : i32, i32, i32
  }
  func.func @transform_2(%arg0: i32) -> (i32, i32) {
    %c0_i32 = arith.constant 0 : i32
    %c0_i32_0 = arith.constant 0 : i32
    %c0_i32_1 = arith.constant 0 : i32
    return %c0_i32, %c0_i32_0 : i32, i32
  }
  func.func @transform_3(%arg0: i32) -> (i32, i32) {
    %c0_i32 = arith.constant 0 : i32
    %c0_i32_0 = arith.constant 0 : i32
    %c0_i32_1 = arith.constant 0 : i32
    return %c0_i32, %c0_i32_0 : i32, i32
  }
  func.func @transform_4(%arg0: i32) -> (i32, i32, i32) {
    %c0_i32 = arith.constant 0 : i32
    %c0_i32_0 = arith.constant 0 : i32
    %c0_i32_1 = arith.constant 0 : i32
    %c0_i32_2 = arith.constant 0 : i32
    return %c0_i32, %c0_i32_0, %c0_i32_1 : i32, i32, i32
  }
}

</mosaic_0001>

<bundles_post_ra>
// kernel: forward.1
= control target key start
LH: loop header
LB: loop body
LE: loop exit
PB: predicated region body
PF: predicated region fallthrough
CT: control target
= control target key end

     0   :  { %9 = vsyncpa [#allocation3], 0  ;;  %s1621_s15 = smov [#allocation2]   ;;  %s1828_s0 = inlined_call_operand.vmem [shape: bf16[3,16,17], index: 0, kind: input, shape index: {}]   ;;  %s1829_s1 = inlined_call_operand.vmem [shape: bf16[4,16,16], index: 1, kind: input, shape index: {}]   ;;  %s1830_s2 = inlined_call_operand.vmem [shape: bf16[17,896], index: 2, kind: input, shape index: {}]   ;;  %s1831_s3 = inlined_call_operand.hbm [shape: bf16[128,896], index: 3, kind: input, shape index: {}]   ;;  %s1832_s4 = inlined_call_operand.vmem [shape: f32[3,16,128], index: 4, kind: output, shape index: {}]  }
   0x1   :  { %s21_s16 = sshll.u32 %s1621_s15, 4  ;;  %s1597_s19 = scalar_lea.hbm %s1831_s3, 7168  ;;  %s22_s16 = int_to_ptr.vmem [resolvable:$true] %s21_s16 }
   0x2   :  { %p1598_p0 = scmp.ne.s32.totalorder %s1831_s3, %s1597_s19  ;;  %p1601_p1 = scmp.lt.u32.totalorder %s1597_s19, %s1831_s3 }
   0x4   :  { %p1603_p2 = pnand %p1601_p1, %p1598_p0 }
   0x6   :  { %1606 = shalt.err (!%p1603_p2)
}
   0x7   :  { %s1607_s24 = scalar_lea.vmem %s22_s16, 7168  ;;  %p1612_p4 = scmp.lt.s32.totalorder %s22_s16, %s22_s16 }
   0x8   :  { %p1608_p3 = scmp.ne.s32.totalorder %s22_s16, %s1607_s24  ;;  %p1613_p5 = scmp.lt.s32.totalorder %s1607_s24, %s1607_s24 }
   0xa   :  { %p1614_p6 = por %p1613_p5, %p1612_p4 }
   0xc   :  { %p1615_p7 = pnand %p1614_p6, %p1608_p3 }
   0xe   :  { %1618 = shalt.err (!%p1615_p7)
}
   0xf   :  { %s1622_s25 = smov 448   ;;  %s1623_s26 = smov 28  }
  0x10   :  { %27 = dma.hbm_to_vmem [thread:$0]  %s1831_s3, 7168, %s22_s16, [#allocation3], %s1622_s25, %s1622_s25, %s1623_s26  }
  0x11   :  { %1619 = dma.done.wait [#allocation3], 7168  }
  0x12   :  { %1620 = vsyncadd [#allocation3], 4294960128  ;;  %v1624_v0 = vmov 0   ;;  %v1625_v1 = vmov 0.0   ;;  %vm67_vm0 = vcmask 1040384   ;;  %vm63_vm1 = vcmask 138240  }
  0x13   :  { %108 = vmatprep.mubr.bf16.mxu0 %v1624_v0  ;;  %198 = vmatprep.mubr.bf16.mxu1 %v1624_v0  ;;  %1382 = vst [vmem:[%s1832_s4 + $0x28] sm:$0xff] %v1625_v1  ;;  %v1493_v2 = vld [vmem:[%s1830_s2 + $0x4] ss:$28 sps:$4 sm:$0xff]   ;;  %v1495_v3 = vld [vmem:[%s1830_s2 + $0xc] ss:$28 sps:$4 sm:$0xff]   ;;  %v69_v4 = vsel %vm67_vm0, 65535, %v1624_v0 }
  0x14   :  { %76 = vmatprep.subr.bf16.mxu0 %v1493_v2  ;;  %v1497_v5 = vld [vmem:[%s1830_s2] ss:$28 sps:$4 sm:$0xff]   ;;  %v1498_v6 = vld [vmem:[%s1830_s2 + $0x8] ss:$28 sps:$4 sm:$0xff]   ;;  %166 = vmatprep.subr.bf16.mxu1 %v1495_v3  ;;  %v1507_v18 = vld [vmem:[%s1830_s2 + $0x18] ss:$28 sps:$4 sm:$0xff]  }
  0x15   :  { %v42_v7 = vld [vmem:[%s1830_s2 + $0x38] sm:$0x11]  ;;  %v123_v9 = vld [vmem:[%s1830_s2 + $0x40] sm:$0x11]  ;;  %77 = vmatpush1.bf16.msra.mxu0 %v1497_v5  ;;  %167 = vmatpush1.bf16.msra.mxu1 %v1498_v6  ;;  %v1505_v19 = vld [vmem:[%s1830_s2 + $0x14] ss:$28 sps:$4 sm:$0xff]  }
  0x16   :  { %v1288_v8 = vcombine.high %v42_v7, %v42_v7  ;;  %v1287_v10 = vcombine.low %v42_v7, %v42_v7  ;;  %v1295_v11 = vcombine.high %v123_v9, %v123_v9  ;;  %v1294_v12 = vcombine.low %v123_v9, %v123_v9  ;;  %v1503_v17 = vld [vmem:[%s1828_s0] sm:$0xff]   ;;  %v1508_v20 = vld [vmem:[%s1830_s2 + $0x10] ss:$28 sps:$4 sm:$0xff]   ;;  %v1511_v24 = vld [vmem:[%s1830_s2 + $0x48] ss:$0 sps:$4 sm:$0x11]  }
  0x17   :  { %v252_v21 = vld [vmem:[%s1830_s2 + $0x4c] sm:$0x11]  ;;  %v164_v27 = vand.u32 %v1511_v24, %v69_v4  ;;  %vm1626_vm2 = vmmov 0   ;;  %v1743_v49 = vld [vmem:[%s1829_s1 + $0x18] sm:$0xff]   ;;  %vm334_vm3 = vcmask 130048   ;;  %v1768_v56 = vld [vmem:[%s1829_s1] sm:$0xff]  }
  0x18   :  { %v74_v13 = vand.u32 %v1288_v8, %v69_v4  ;;  %v71_v14 = vand.u32 %v1287_v10, %v69_v4  ;;  %v161_v15 = vand.u32 %v1295_v11, %v69_v4  ;;  %v158_v16 = vand.u32 %v1294_v12, %v69_v4  ;;  %v1504_v22 = vld [vmem:[%s1828_s0 + $0x8] sm:$0xff]   ;;  %v1512_v29 = vld [vmem:[%s1828_s0 + $0x10] sm:$0xff]   ;;  %v1519_v52 = vld [vmem:[#allocation2 + $0x4] ss:$28 sps:$4 sm:$0xff]  }
  0x19   :  { %v1303_v23 = vcombine.high %v252_v21, %v252_v21  ;;  %v1302_v25 = vcombine.low %v252_v21, %v252_v21  ;;  %v1749_v51 = vld [vmem:[%s1829_s1 + $0x8] sm:$0xff]   ;;  %v1763_v54 = vld [vmem:[%s1829_s1 + $0x10] sm:$0xff]   ;;  %v1517_v55 = vld [vmem:[#allocation2] ss:$28 sps:$4 sm:$0xff]  }
  0x1a   :  { %78 = vmatprep.subr.bf16.mxu0 %v74_v13  ;;  %168 = vmatprep.subr.bf16.mxu1 %v161_v15  ;;  %v1528_v53 = vld [vmem:[#allocation2 + $0xc] ss:$28 sps:$4 sm:$0xff]   ;;  %v1522_v57 = vld [vmem:[#allocation2 + $0x3c] ss:$28 sps:$4 sm:$0xff]   ;;  %v1534_v59 = vld [vmem:[#allocation2 + $0x44] ss:$28 sps:$4 sm:$0xff]  }
  0x1b   :  { %79 = vmatpush1.bf16.msra.mxu0 %v71_v14  ;;  %169 = vmatpush1.bf16.msra.mxu1 %v158_v16  ;;  %v280_v26 = vand.u32 %v1303_v23, %v69_v4  ;;  %v277_v28 = vand.u32 %v1302_v25, %v69_v4  ;;  %v1526_v58 = vld [vmem:[#allocation2 + $0x8] ss:$28 sps:$4 sm:$0xff]   ;;  %v1520_v60 = vld [vmem:[#allocation2 + $0x38] ss:$28 sps:$4 sm:$0xff]   ;;  %v1532_v62 = vld [vmem:[#allocation2 + $0x40] ss:$28 sps:$4 sm:$0xff]  }
  0x1c   :  { %1411 = vmatprep.subr.bf16.mxu0 %v1625_v1  ;;  %282 = vmatprep.subr.bf16.mxu1 %v1507_v18  ;;  %v1525_v61 = vld [vmem:[#allocation2 + $0x74] ss:$28 sps:$4 sm:$0xff]   ;;  %v1540_v63 = vld [vmem:[#allocation2 + $0x7c] ss:$28 sps:$4 sm:$0xff]   ;;  %v1531_v3 = vld [vmem:[#allocation2 + $0xac] ss:$28 sps:$4 sm:$0xff]  }
  0x1d   :  { %v1523_v2 = vld [vmem:[#allocation2 + $0x70] ss:$28 sps:$4 sm:$0xff]   ;;  %v1538_v4 = vld [vmem:[#allocation2 + $0x78] ss:$28 sps:$4 sm:$0xff]   ;;  %v1529_v6 = vld [vmem:[#allocation2 + $0xa8] ss:$28 sps:$4 sm:$0xff]  }
  0x1e   :  { %1289 = vmatmul.mubr.msk.bf16.vlgmr.msra.gmra.mrb[0].mxu0 %vm63_vm1, %v1503_v17  ;;  %1297 = vmatmul.mubr.msk.bf16.vlgmr.msra.gmra.mrb[0].mxu1 %vm63_vm1, %v1504_v22  ;;  %v1546_v5 = vld [vmem:[#allocation2 + $0xb4] ss:$28 sps:$4 sm:$0xff]   ;;  %v1537_v7 = vld [vmem:[#allocation2 + $0xe4] ss:$28 sps:$4 sm:$0xff]   ;;  %v1543_v10 = vld [vmem:[#allocation2 + $0x11c] ss:$28 sps:$4 sm:$0xff]  }
  0x1f   :  { %1412 = vmatpush3.bf16.msra.mxu0 %v1508_v20  ;;  %283 = vmatpush1.bf16.msra.mxu1 %v1505_v19  ;;  %v1544_v8 = vld [vmem:[#allocation2 + $0xb0] ss:$28 sps:$4 sm:$0xff]   ;;  %v1535_v9 = vld [vmem:[#allocation2 + $0xe0] ss:$28 sps:$4 sm:$0xff]   ;;  %v1541_v11 = vld [vmem:[#allocation2 + $0x118] ss:$28 sps:$4 sm:$0xff]  }
  0x20   :  { %1413 = vmatprep.subr.bf16.mxu0 %v1625_v1  ;;  %284 = vmatprep.subr.bf16.mxu1 %v280_v26  ;;  %v1549_v12 = vld [vmem:[#allocation2 + $0x154] ss:$28 sps:$4 sm:$0xff]   ;;  %v1552_v13 = vld [vmem:[#allocation2 + $0xec] ss:$28 sps:$4 sm:$0xff]   ;;  %v1558_v17 = vld [vmem:[#allocation2 + $0x124] ss:$28 sps:$4 sm:$0xff]  }
  0x21   :  { %1415 = vmatprep.mubr.msk.bf16.mxu0 %vm1626_vm2, %v1625_v1  ;;  %314 = vmatprep.mubr.bf16.mxu1 %v1624_v0  ;;  %v1547_v14 = vld [vmem:[#allocation2 + $0x150] ss:$28 sps:$4 sm:$0xff]   ;;  %v1550_v15 = vld [vmem:[#allocation2 + $0xe8] ss:$28 sps:$4 sm:$0xff]   ;;  %v1556_v19 = vld [vmem:[#allocation2 + $0x120] ss:$28 sps:$4 sm:$0xff]  }
  0x22   :  { %v1555_v16 = vld [vmem:[#allocation2 + $0x18c] ss:$28 sps:$4 sm:$0xff]   ;;  %v1561_v20 = vld [vmem:[#allocation2 + $0x15c] ss:$28 sps:$4 sm:$0xff]  }
  0x23   :  { %1414 = vmatpush3.bf16.msra.mxu0 %v164_v27  ;;  %285 = vmatpush1.bf16.msra.mxu1 %v277_v28  ;;  %v1553_v18 = vld [vmem:[#allocation2 + $0x188] ss:$28 sps:$4 sm:$0xff]   ;;  %v1559_v21 = vld [vmem:[#allocation2 + $0x158] ss:$28 sps:$4 sm:$0xff]   ;;  %v1563_v23 = vld [vmem:[#allocation2 + $0x190] ss:$28 sps:$4 sm:$0xff]  }
  0x24   :  { %1419 = vmatprep.subr.bf16.mxu0 %v1625_v1  ;;  %1425 = vmatprep.subr.bf16.mxu1 %v1625_v1  ;;  %v1569_v24 = vld [vmem:[#allocation2 + $0x18] ss:$28 sps:$4 sm:$0xff]  }
  0x26   :  { %1416 = vmatmul.mubr.msk.bf16.vlgmr.msra.gmra.mrb[4].mxu0 %vm63_vm1, %v1504_v22  ;;  %1304 = vmatmul.mubr.msk.bf16.vlgmr.msra.gmra.mrb[4].mxu1 %vm63_vm1, %v1512_v29  ;;  %v1565_v22 = vld [vmem:[#allocation2 + $0x194] ss:$28 sps:$4 sm:$0xff]  }
  0x27   :  { %1421 = vmatprep.mubr.msk.bf16.mxu0 %vm1626_vm2, %v1625_v1  ;;  %1427 = vmatprep.mubr.msk.bf16.mxu1 %vm1626_vm2, %v1625_v1 }
  0xf1   :  { %v1728_v30 = vpop.f32.mrb[0].mxu0  ;;  %v1730_v32 = vpop.f32.mrb[0].mxu1 }
  0xf2   :  { %v112_v31 = vpop.f32.mrb[1].mxu0  ;;  %v202_v34 = vpop.f32.mrb[1].mxu1 }
  0xf3   :  { %v1732_v33 = vpop.f32.mrb[2].mxu0  ;;  %v1734_v36 = vpop.f32.mrb[2].mxu1 }
  0xf4   :  { %v116_v35 = vpop.f32.mrb[3].mxu0  ;;  %v206_v38 = vpop.f32.mrb[3].mxu1 }
  0xf5   :  { %v436_v37 = vpack.c.bf16 %v116_v35, %v112_v31  ;;  %v491_v39 = vpack.c.bf16 %v206_v38, %v202_v34 }
  0xf9   :  { %v243_v40 = vpop.f32.mrb[4].mxu0  ;;  %v1736_v41 = vpop.f32.mrb[4].mxu1 }
  0xfa   :  { %v1417_v42 = vpop.f32.mrb[5].mxu0  ;;  %v318_v43 = vpop.f32.mrb[5].mxu1 }
  0xfb   :  { %v246_v44 = vpop.f32.mrb[6].mxu0  ;;  %v1738_v46 = vpop.f32.mrb[6].mxu1 }
  0xfc   :  { %v325_v45 = vpack.c.bf16 %v246_v44, %v243_v40  ;;  %v1418_v47 = vpop.f32.mrb[7].mxu0  ;;  %v322_v48 = vpop.f32.mrb[7].mxu1  ;;  %v1562_v44 = vld [vmem:[#allocation2 + $0x10] ss:$28 sps:$4 sm:$0xff]  }
  0xfd   :  { %v381_v50 = vpack.c.bf16 %v322_v48, %v318_v43 }
  0xfe   :  { %1420 = vmatpush3.bf16.msra.mxu0 %v325_v45 }
  0xff   :  { %1431 = vmatprep.subr.bf16.mxu0 %v1625_v1  ;;  %1426 = vmatpush3.bf16.msra.mxu1 %v381_v50 }
 0x100   :  { %1437 = vmatprep.subr.bf16.mxu1 %v1625_v1 }
 0x101   :  { %1422 = vmatmul.mubr.msk.bf16.vlgmr.msra.gmra.mrb[8].mxu0 %vm334_vm3, %v1743_v49 }
 0x102   :  { %1432 = vmatpush3.bf16.msra.mxu0 %v436_v37  ;;  %1433 = vmatprep.mubr.msk.bf16.mxu0 %vm1626_vm2, %v1625_v1 }
 0x103   :  { %1428 = vmatmul.mubr.msk.bf16.vlgmr.msra.gmra.mrb[8].mxu1 %vm334_vm3, %v1749_v51  ;;  %650 = vmatprep.subr.bf16.mxu0 %v1519_v52 }
 0x104   :  { %1438 = vmatpush3.bf16.msra.mxu1 %v491_v39  ;;  %1439 = vmatprep.mubr.msk.bf16.mxu1 %vm1626_vm2, %v1625_v1 }
 0x105   :  { %853 = vmatprep.subr.bf16.mxu1 %v1528_v53 }
 0x109   :  { %1434 = vmatmul.mubr.msk.bf16.vlgmr.msra.gmra.mrb[12].mxu0 %vm334_vm3, %v1763_v54 }
 0x10a   :  { %651 = vmatpush1.bf16.msra.mxu0 %v1517_v55  ;;  %682 = vmatprep.mubr.bf16.mxu0 %v1624_v0 }
 0x10b   :  { %1440 = vmatmul.mubr.msk.bf16.vlgmr.msra.gmra.mrb[12].mxu1 %vm334_vm3, %v1768_v56  ;;  %652 = vmatprep.subr.bf16.mxu0 %v1522_v57 }
 0x10c   :  { %854 = vmatpush1.bf16.msra.mxu1 %v1526_v58  ;;  %885 = vmatprep.mubr.bf16.mxu1 %v1624_v0 }
 0x10d   :  { %855 = vmatprep.subr.bf16.mxu1 %v1534_v59 }
 0x10e   :  { %653 = vmatpush1.bf16.msra.mxu0 %v1520_v60 }
 0x10f   :  { %654 = vmatprep.subr.bf16.mxu0 %v1525_v61 }
 0x110   :  { %856 = vmatpush1.bf16.msra.mxu1 %v1532_v62  ;;  %v1567_v62 = vld [vmem:[#allocation2 + $0x14] ss:$28 sps:$4 sm:$0xff]  }
 0x111   :  { %857 = vmatprep.subr.bf16.mxu1 %v1540_v63  ;;  %v1570_v63 = vld [vmem:[#allocation2 + $0x80] ss:$28 sps:$4 sm:$0xff]  }
 0x112   :  { %655 = vmatpush1.bf16.msra.mxu0 %v1523_v2 }
 0x113   :  { %656 = vmatprep.subr.bf16.mxu0 %v1531_v3 }
 0x114   :  { %858 = vmatpush1.bf16.msra.mxu1 %v1538_v4 }
 0x115   :  { %859 = vmatprep.subr.bf16.mxu1 %v1546_v5 }
 0x116   :  { %657 = vmatpush1.bf16.msra.mxu0 %v1529_v6  ;;  %v1571_v6 = vld [vmem:[#allocation2 + $0x4c] ss:$28 sps:$4 sm:$0xff]  }
 0x117   :  { %658 = vmatprep.subr.bf16.mxu0 %v1537_v7  ;;  %v1574_v7 = vld [vmem:[#allocation2 + $0xb8] ss:$28 sps:$4 sm:$0xff]  }
 0x118   :  { %860 = vmatpush1.bf16.msra.mxu1 %v1544_v8  ;;  %v1575_v8 = vld [vmem:[#allocation2 + $0x84] ss:$28 sps:$4 sm:$0xff]  }
 0x119   :  { %861 = vmatprep.subr.bf16.mxu1 %v1552_v13  ;;  %v1585_v13 = vld [vmem:[#allocation2 + $0xf8] ss:$28 sps:$4 sm:$0xff]  }
 0x11a   :  { %659 = vmatpush1.bf16.msra.mxu0 %v1535_v9  ;;  %v1578_v9 = vld [vmem:[#allocation2 + $0xf0] ss:$28 sps:$4 sm:$0xff]  }
 0x11b   :  { %660 = vmatprep.subr.bf16.mxu0 %v1543_v10  ;;  %v1581_v10 = vld [vmem:[#allocation2 + $0xc0] ss:$28 sps:$4 sm:$0xff]  }
 0x11c   :  { %862 = vmatpush1.bf16.msra.mxu1 %v1550_v15  ;;  %v1589_v15 = vld [vmem:[#allocation2 + $0x130] ss:$28 sps:$4 sm:$0xff]  }
 0x11d   :  { %863 = vmatprep.subr.bf16.mxu1 %v1558_v17  ;;  %v1590_v17 = vld [vmem:[#allocation2 + $0x198] ss:$28 sps:$4 sm:$0xff]  }
 0x11e   :  { %661 = vmatpush1.bf16.msra.mxu0 %v1541_v11  ;;  %v1579_v11 = vld [vmem:[#allocation2 + $0xbc] ss:$28 sps:$4 sm:$0xff]  }
 0x11f   :  { %662 = vmatprep.subr.bf16.mxu0 %v1549_v12  ;;  %v1582_v12 = vld [vmem:[#allocation2 + $0x128] ss:$28 sps:$4 sm:$0xff]  }
 0x120   :  { %864 = vmatpush1.bf16.msra.mxu1 %v1556_v19  ;;  %v1591_v19 = vld [vmem:[#allocation2 + $0x164] ss:$28 sps:$4 sm:$0xff]  }
 0x121   :  { %865 = vmatprep.subr.bf16.mxu1 %v1561_v20  ;;  %v1596_v20 = vld [vmem:[#allocation2 + $0x1a0] ss:$28 sps:$4 sm:$0xff]  }
 0x122   :  { %663 = vmatpush1.bf16.msra.mxu0 %v1547_v14  ;;  %v1583_v14 = vld [vmem:[#allocation2 + $0xf4] ss:$28 sps:$4 sm:$0xff]  }
 0x123   :  { %664 = vmatprep.subr.bf16.mxu0 %v1555_v16  ;;  %v1587_v16 = vld [vmem:[#allocation2 + $0x12c] ss:$28 sps:$4 sm:$0xff]  }
 0x124   :  { %866 = vmatpush1.bf16.msra.mxu1 %v1559_v21  ;;  %v1594_v21 = vld [vmem:[#allocation2 + $0x19c] ss:$28 sps:$4 sm:$0xff]  }
 0x125   :  { %867 = vmatprep.subr.bf16.mxu1 %v1565_v22 }
 0x126   :  { %665 = vmatpush1.bf16.msra.mxu0 %v1553_v18  ;;  %v1593_v18 = vld [vmem:[#allocation2 + $0x168] ss:$28 sps:$4 sm:$0xff]  }
 0x127   :  { %1443 = vmatprep.subr.bf16.mxu0 %v1625_v1 }
 0x128   :  { %868 = vmatpush1.bf16.msra.mxu1 %v1563_v23 }
 0x129   :  { %1033 = vmatprep.subr.bf16.mxu1 %v1569_v24 }
 0x1d4   :  { %v372_v25 = vpop.f32.mrb[8].mxu0 }
 0x1d5   :  { %v379_v26 = vadd.f32 %v372_v25, %v1728_v30  ;;  %v1423_v27 = vpop.f32.mrb[9].mxu0 }
 0x1d6   :  { %v427_v28 = vpop.f32.mrb[8].mxu1  ;;  %v375_v29 = vpop.f32.mrb[10].mxu0 }
 0x1d7   :  { %v434_v31 = vadd.f32 %v427_v28, %v1730_v32  ;;  %v380_v34 = vadd.f32 %v375_v29, %v1732_v33  ;;  %v1429_v35 = vpop.f32.mrb[9].mxu1  ;;  %v1424_v37 = vpop.f32.mrb[11].mxu0  ;;  %v545_v39 = vmax.f32 %v379_v26, 0.0  ;;  %v1566_v32 = vld [vmem:[#allocation2 + $0x48] ss:$28 sps:$4 sm:$0xff]  }
 0x1d8   :  { %v430_v38 = vpop.f32.mrb[10].mxu1 }
 0x1d9   :  { %v546_v40 = vmax.f32 %v380_v34, 0.0  ;;  %v435_v42 = vadd.f32 %v430_v38, %v1734_v36  ;;  %v1430_v43 = vpop.f32.mrb[11].mxu1 }
 0x1db   :  { %v547_v45 = vpack.c.bf16 %v546_v40, %v545_v39 }
 0x1dc   :  { %v482_v47 = vpop.f32.mrb[12].mxu0 }
 0x1dd   :  { %v489_v48 = vadd.f32 %v482_v47, %v434_v31  ;;  %v1435_v30 = vpop.f32.mrb[13].mxu0  ;;  %683 = vmatmul.mubr.bf16.vlgmr.msra.gmra.mrb[16].mxu0 %v547_v45 }
 0x1de   :  { %v536_v50 = vpop.f32.mrb[12].mxu1  ;;  %1444 = vmatpush3.bf16.msra.mxu0 %v1562_v44  ;;  %v485_v52 = vpop.f32.mrb[14].mxu0  ;;  %1459 = vmatprep.mubr.msk.bf16.mxu0 %vm1626_vm2, %v1625_v1 }
 0x1df   :  { %v543_v33 = vadd.f32 %v536_v50, %v1736_v41  ;;  %v490_v53 = vadd.f32 %v485_v52, %v435_v42  ;;  %v1441_v55 = vpop.f32.mrb[13].mxu1  ;;  %v1436_v57 = vpop.f32.mrb[15].mxu0  ;;  %1445 = vmatprep.subr.bf16.mxu0 %v1625_v1  ;;  %v548_v58 = vmax.f32 %v489_v48, 0.0  ;;  %v1573_v41 = vld [vmem:[#allocation2 + $0x50] ss:$28 sps:$4 sm:$0xff]  }
 0x1e0   :  { %v539_v36 = vpop.f32.mrb[14].mxu1 }
 0x1e1   :  { %v549_v59 = vmax.f32 %v490_v53, 0.0  ;;  %v544_v60 = vadd.f32 %v539_v36, %v1738_v46  ;;  %v1442_v61 = vpop.f32.mrb[15].mxu1  ;;  %v551_v2 = vmax.f32 %v543_v33, 0.0  ;;  %v1577_v46 = vld [vmem:[#allocation2 + $0x88] ss:$28 sps:$4 sm:$0xff]  }
 0x1e2   :  { %1446 = vmatpush3.bf16.msra.mxu0 %v1566_v32 }
 0x1e3   :  { %v550_v3 = vpack.c.bf16 %v549_v59, %v548_v58  ;;  %v552_v4 = vmax.f32 %v544_v60, 0.0  ;;  %1447 = vmatprep.subr.bf16.mxu0 %v1625_v1 }
 0x1e5   :  { %v553_v5 = vpack.c.bf16 %v552_v4, %v551_v2  ;;  %886 = vmatmul.mubr.bf16.vlgmr.msra.gmra.mrb[16].mxu1 %v550_v3 }
 0x1e6   :  { %1448 = vmatpush3.bf16.msra.mxu0 %v1570_v63  ;;  %1034 = vmatpush1.bf16.msra.mxu1 %v1567_v62 }
 0x1e7   :  { %1449 = vmatprep.subr.bf16.mxu0 %v1625_v1  ;;  %1035 = vmatprep.subr.bf16.mxu1 %v1573_v41 }
 0x1e8   :  { %1065 = vmatprep.mubr.bf16.mxu1 %v1624_v0  ;;  %v1586_v0 = vld [vmem:[#allocation2 + $0x160] ss:$28 sps:$4 sm:$0xff]  }
 0x1ea   :  { %1450 = vmatpush3.bf16.msra.mxu0 %v1574_v7  ;;  %1036 = vmatpush1.bf16.msra.mxu1 %v1571_v6 }
 0x1eb   :  { %1451 = vmatprep.subr.bf16.mxu0 %v1625_v1  ;;  %1037 = vmatprep.subr.bf16.mxu1 %v1577_v46 }
 0x1ee   :  { %1452 = vmatpush3.bf16.msra.mxu0 %v1578_v9  ;;  %1038 = vmatpush1.bf16.msra.mxu1 %v1575_v8 }
 0x1ef   :  { %1453 = vmatprep.subr.bf16.mxu0 %v1625_v1  ;;  %1039 = vmatprep.subr.bf16.mxu1 %v1581_v10 }
 0x1f2   :  { %1454 = vmatpush3.bf16.msra.mxu0 %v1582_v12  ;;  %1040 = vmatpush1.bf16.msra.mxu1 %v1579_v11 }
 0x1f3   :  { %1455 = vmatprep.subr.bf16.mxu0 %v1625_v1  ;;  %1041 = vmatprep.subr.bf16.mxu1 %v1585_v13 }
 0x1f6   :  { %1456 = vmatpush3.bf16.msra.mxu0 %v1586_v0  ;;  %1042 = vmatpush1.bf16.msra.mxu1 %v1583_v14 }
 0x1f7   :  { %1457 = vmatprep.subr.bf16.mxu0 %v1625_v1  ;;  %1043 = vmatprep.subr.bf16.mxu1 %v1589_v15 }
 0x1fa   :  { %1458 = vmatpush3.bf16.msra.mxu0 %v1590_v17  ;;  %1044 = vmatpush1.bf16.msra.mxu1 %v1587_v16 }
 0x1fb   :  { %1045 = vmatprep.subr.bf16.mxu1 %v1593_v18  ;;  %1463 = vmatprep.subr.bf16.mxu0 %v1625_v1 }
 0x1fd   :  { %1460 = vmatmul.mubr.bf16.vlgmr.msra.gmra.mrb[20].mxu0 %v550_v3 }
 0x1fe   :  { %1046 = vmatpush1.bf16.msra.mxu1 %v1591_v19  ;;  %1465 = vmatprep.mubr.msk.bf16.mxu0 %vm1626_vm2, %v1625_v1 }
 0x1ff   :  { %1047 = vmatprep.subr.bf16.mxu1 %v1596_v20 }
 0x202   :  { %1048 = vmatpush1.bf16.msra.mxu1 %v1594_v21 }
 0x203   :  { %1469 = vmatprep.subr.bf16.mxu1 %v1625_v1 }
 0x205   :  { %1066 = vmatmul.mubr.bf16.vlgmr.msra.gmra.mrb[20].mxu1 %v553_v5 }
 0x206   :  { %1471 = vmatprep.mubr.msk.bf16.mxu1 %vm1626_vm2, %v1625_v1 }
 0x2b0   :  { %v684_v22 = vpop.f32.mrb[16].mxu0 }
 0x2b1   :  { %v686_v23 = vpop.f32.mrb[17].mxu0 }
 0x2b2   :  { %v688_v24 = vpop.f32.mrb[18].mxu0 }
 0x2b3   :  { %v690_v25 = vpop.f32.mrb[19].mxu0 }
 0x2b4   :  { %v1164_v26 = vpack.c.bf16 %v690_v25, %v686_v23 }
 0x2b8   :  { %v887_v27 = vpop.f32.mrb[16].mxu1 }
 0x2b9   :  { %v889_v28 = vpop.f32.mrb[17].mxu1 }
 0x2ba   :  { %v891_v29 = vpop.f32.mrb[18].mxu1 }
 0x2bb   :  { %v893_v31 = vpop.f32.mrb[19].mxu1 }
 0x2bc   :  { %v1208_v34 = vpack.c.bf16 %v893_v31, %v889_v28 }
 0x2d0   :  { %v930_v35 = vpop.f32.mrb[20].mxu0 }
 0x2d1   :  { %v1461_v37 = vpop.f32.mrb[21].mxu0 }
 0x2d2   :  { %v933_v38 = vpop.f32.mrb[22].mxu0 }
 0x2d3   :  { %v1076_v39 = vpack.c.bf16 %v933_v38, %v930_v35  ;;  %v1462_v40 = vpop.f32.mrb[23].mxu0 }
 0x2d5   :  { %1464 = vmatpush3.bf16.msra.mxu0 %v1076_v39 }
 0x2d6   :  { %1475 = vmatprep.subr.bf16.mxu0 %v1625_v1 }
 0x2d8   :  { %v1067_v42 = vpop.f32.mrb[20].mxu1  ;;  %1466 = vmatmul.mubr.msk.bf16.vlgmr.msra.gmra.mrb[24].mxu0 %vm334_vm3, %v1743_v49  ;;  %v1252_v49 = vlaneseq }
 0x2d9   :  { %v1069_v43 = vpop.f32.mrb[21].mxu1  ;;  %1476 = vmatpush3.bf16.msra.mxu0 %v1164_v26  ;;  %1477 = vmatprep.mubr.msk.bf16.mxu0 %vm1626_vm2, %v1625_v1 }
 0x2da   :  { %v1071_v44 = vpop.f32.mrb[22].mxu1  ;;  %v1253_v48 = vshrl.u32 %v1252_v49, 7 }
 0x2db   :  { %v1073_v45 = vpop.f32.mrb[23].mxu1 }
 0x2dc   :  { %v1120_v47 = vpack.c.bf16 %v1073_v45, %v1069_v43  ;;  %v1254_v30 = vadd.s32 8, %v1253_v48  ;;  %vm1268_vm6 = vcmp.lt.s32.totalorder %v1253_v48, 6 }
 0x2de   :  { %1470 = vmatpush3.bf16.msra.mxu1 %v1120_v47  ;;  %vm1256_vm4 = vcmp.lt.s32.totalorder %v1254_v30, 10  ;;  %vm1262_vm5 = vcmp.lt.s32.totalorder %v1254_v30, 12 }
 0x2df   :  { %1481 = vmatprep.subr.bf16.mxu1 %v1625_v1 }
 0x2e0   :  { %1478 = vmatmul.mubr.msk.bf16.vlgmr.msra.gmra.mrb[28].mxu0 %vm334_vm3, %v1763_v54 }
 0x2e1   :  { %1472 = vmatmul.mubr.msk.bf16.vlgmr.msra.gmra.mrb[24].mxu1 %vm334_vm3, %v1749_v51 }
 0x2e2   :  { %1482 = vmatpush3.bf16.msra.mxu1 %v1208_v34  ;;  %1483 = vmatprep.mubr.msk.bf16.mxu1 %vm1626_vm2, %v1625_v1 }
 0x2e9   :  { %1484 = vmatmul.mubr.msk.bf16.vlgmr.msra.gmra.mrb[28].mxu1 %vm334_vm3, %v1768_v56 }
 0x3ab   :  { %v1111_v50 = vpop.f32.mrb[24].mxu0 }
 0x3ac   :  { %v1118_v52 = vadd.f32 %v1111_v50, %v684_v22  ;;  %v1467_v32 = vpop.f32.mrb[25].mxu0 }
 0x3ad   :  { %v1114_v33 = vpop.f32.mrb[26].mxu0 }
 0x3ae   :  { %1259 = vst [vmem:[%s1832_s4] sm:$0xff] %v1118_v52  ;;  %v1119_v51 = vadd.f32 %v1114_v33, %v688_v24  ;;  %v1468_v54 = vpop.f32.mrb[27].mxu0 }
 0x3b0   :  { %v1258_v53 = vsel %vm1256_vm4, %v1119_v51, 0.0 }
 0x3b1   :  { %1260 = vst [vmem:[%s1832_s4 + $0x8] sm:$0xff] %v1258_v53 }
 0x3b3   :  { %v1199_v1 = vpop.f32.mrb[28].mxu0 }
 0x3b4   :  { %v1155_v56 = vpop.f32.mrb[24].mxu1  ;;  %v1479_v55 = vpop.f32.mrb[29].mxu0 }
 0x3b5   :  { %v1162_v57 = vadd.f32 %v1155_v56, %v887_v27  ;;  %v1473_v36 = vpop.f32.mrb[25].mxu1  ;;  %v1202_v58 = vpop.f32.mrb[30].mxu0 }
 0x3b6   :  { %v1158_v59 = vpop.f32.mrb[26].mxu1  ;;  %v1480_v60 = vpop.f32.mrb[31].mxu0 }
 0x3b7   :  { %v1163_v61 = vadd.f32 %v1158_v59, %v891_v29  ;;  %v1206_v62 = vadd.f32 %v1199_v1, %v1162_v57  ;;  %v1474_v63 = vpop.f32.mrb[27].mxu1 }
 0x3b9   :  { %1379 = vst [vmem:[%s1832_s4 + $0x10] sm:$0xff] %v1206_v62  ;;  %v1207_v2 = vadd.f32 %v1202_v58, %v1163_v61 }
 0x3bb   :  { %v1264_v3 = vsel %vm1262_vm5, %v1207_v2, 0.0 }
 0x3bc   :  { %1380 = vst [vmem:[%s1832_s4 + $0x18] sm:$0xff] %v1264_v3  ;;  %v1243_v4 = vpop.f32.mrb[28].mxu1 }
 0x3bd   :  { %v1250_v41 = vadd.f32 %v1243_v4, %v1067_v42  ;;  %v1485_v5 = vpop.f32.mrb[29].mxu1 }
 0x3be   :  { %v1246_v6 = vpop.f32.mrb[30].mxu1 }
 0x3bf   :  { %v1270_v7 = vsel %vm1268_vm6, %v1250_v41, 0.0  ;;  %v1486_v46 = vpop.f32.mrb[31].mxu1 }
 0x3c0   :  { %1381 = vst [vmem:[%s1832_s4 + $0x20] sm:$0xff] %v1270_v7 }
 0x3c1   :  { %1279 = vsyncpa [#allocation3], 1 }

</bundles_post_ra>
